<compile_context>
chip_gen: v5e
topology: v5e:2x2
jax: 0.10.0
libtpu: 0.0.40
codegen_flags: <defaults>
</compile_context>

<pallas_src>
import functools

import jax
import jax.numpy as jnp
from jax.experimental import pallas as pl
from jax.experimental.pallas import tpu as pltpu

INPUT_DIM = 2
OUTPUT_DIM = 1
HIDDEN_LAYERS = 4
NEURONS = 64


def _pinn_kernel(x_ref, w1_ref, b1_ref, wh_ref, bh_ref, w5_ref, b5_ref, o_ref,
                 *, compute_dtype):
    """Fused transposed forward pass for one batch tile (all VMEM-resident)."""
    xt = x_ref[...].astype(jnp.float32)                 # (2, tile_n)
    w1 = w1_ref[...]                                    # (64, 2)  = (out, in)
    b1 = b1_ref[...]                                    # (64, 1)

    # Layer 1 (K=2): keep it off the MXU — two VPU broadcast FMAs.
    z = w1[:, 0:1] * xt[0:1, :] + w1[:, 1:2] * xt[1:2, :] + b1
    # tanh runs in compute_dtype (bf16 EUP on v6e/v7x; no-op cast when f32).
    h = jnp.tanh(z.astype(compute_dtype))

    # Hidden layers 2..4: (64, 64) @ (64, tile_n) on the MXU, f32 accumulation.
    # wh_ref is already stored in compute_dtype (cast hoisted to the wrapper).
    for l in range(HIDDEN_LAYERS - 1):
        w = wh_ref[l]                                   # (64, 64) compute_dtype
        b = bh_ref[l]                                   # (64, 1)  f32
        z = jnp.dot(w, h, preferred_element_type=jnp.float32) + b
        h = jnp.tanh(z.astype(compute_dtype))

    # Output layer (N=1): sublane reduction instead of a 1-wide MXU matmul.
    # Result is (1, tile_n) -> lane-dense, unmasked store.
    w5 = w5_ref[...]                                    # (64, 1) f32
    hf = h.astype(jnp.float32)
    out = jnp.sum(w5 * hf, axis=0, keepdims=True) + b5_ref[...]
    o_ref[...] = out.astype(o_ref.dtype)


@functools.partial(jax.jit, static_argnames=("tile_n", "compute_dtype"))
def black_scholes_pinn_forward(x, params, *, tile_n=None,
                               compute_dtype=jnp.float32):
    """x: (N, 2) float32.  params: list of (W, b) in PyTorch (out, in) layout.

    tile_n=None auto-picks a lane-aligned tile (~N/4, capped at 4096) so that
    per-step pipeline overhead is amortized while v7x's two TensorCores still
    get >= 2 grid steps to shard across.  compute_dtype=jnp.bfloat16 is the
    v6e/v7x fast path (validate PINN accuracy first); keep float32 on v5e.
    """
    n, d = x.shape
    assert d == INPUT_DIM

    if tile_n is None:
        # ~4 tiles (megacore-friendly), lane-aligned, capped so the (64,tile_n)
        # activation slab stays small enough to avoid vreg-spill traffic.
        tile_n = min(4096, ((max(128, pl.cdiv(n, 4)) + 127) // 128) * 128)
    assert tile_n % 128 == 0, "tile_n must be lane-aligned (multiple of 128)"

    (w1, b1), (w2, b2), (w3, b3), (w4, b4), (w5, b5) = params
    assert w5.shape[0] == OUTPUT_DIM == 1, "output-layer reduction assumes width-1 head"

    # Pack parameters for the transposed layout.  Hidden weights are cast to
    # compute_dtype HERE (once), not per grid step inside the kernel.
    b1c = b1.reshape(NEURONS, 1)
    wh = jnp.stack([w2, w3, w4]).astype(compute_dtype)            # (3, 64, 64)
    bh = jnp.stack([b2, b3, b4]).reshape(HIDDEN_LAYERS - 1, NEURONS, 1)
    w5c = w5.T                                                    # (64, 1)
    b5c = b5.reshape(OUTPUT_DIM, 1)                               # (1, 1)

    # Pad the batch to a multiple of tile_n and lay it out batch-on-lanes.
    # (The whole wrapper is jitted, so transpose/pad/slice fuse with the call.)
    n_pad = pl.cdiv(n, tile_n) * tile_n
    xt = jnp.transpose(x)                                         # (2, n)
    if n_pad != n:
        xt = jnp.pad(xt, ((0, 0), (0, n_pad - n)))
    grid = (n_pad // tile_n,)

    full2 = lambda a: pl.BlockSpec(a.shape, lambda i: (0, 0))
    full3 = lambda a: pl.BlockSpec(a.shape, lambda i: (0, 0, 0))

    out_t = pl.pallas_call(
        functools.partial(_pinn_kernel, compute_dtype=compute_dtype),
        out_shape=jax.ShapeDtypeStruct((1, n_pad), x.dtype),
        grid_spec=pltpu.PrefetchScalarGridSpec(
            num_scalar_prefetch=0,
            grid=grid,
            in_specs=[
                pl.BlockSpec((INPUT_DIM, tile_n), lambda i: (0, i)),  # x tile
                full2(w1), full2(b1c),
                full3(wh), full3(bh),
                full2(w5c), full2(b5c),
            ],
            out_specs=pl.BlockSpec((1, tile_n), lambda i: (0, i)),
        ),
        # Default VMEM limit is plenty: the only tile_n-scaled tensor is the
        # (64, tile_n) activation slab (~1 MiB at tile_n=4096).
        compiler_params=pltpu.CompilerParams(
            dimension_semantics=("parallel",)),
    )(xt, w1, b1c, wh, bh, w5c, b5c)

    return out_t[0, :n].reshape(n, OUTPUT_DIM)


def init_params(key):
    """nn.Linear-style init: uniform +-1/sqrt(fan_in); W is (out, in), b (out,)."""
    dims = [INPUT_DIM] + [NEURONS] * HIDDEN_LAYERS + [OUTPUT_DIM]
    params = []
    for fan_in, fan_out in zip(dims[:-1], dims[1:]):
        key, kw, kb = jax.random.split(key, 3)
        bound = 1.0 / jnp.sqrt(jnp.float32(fan_in))
        w = jax.random.uniform(kw, (fan_out, fan_in), jnp.float32, -bound, bound)
        b = jax.random.uniform(kb, (fan_out,), jnp.float32, -bound, bound)
        params.append((w, b))
    return params


def reference_forward(x, params):
    """Pure-JAX reference matching the PyTorch module's forward pass."""
    h = x
    for i, (w, b) in enumerate(params):
        h = h @ w.T + b
        if i < len(params) - 1:
            h = jnp.tanh(h)
    return h


if __name__ == "__main__":
    key = jax.random.PRNGKey(0)
    pkey, xkey = jax.random.split(key)

    params = init_params(pkey)

    # Batch of (S, t) collocation points; ragged size exercises the padding
    # path, and the auto tile_n (=256 here) yields 4 parallel tiles (feeds
    # both TensorCores on v7x).
    n = 1000
    x = jax.random.uniform(xkey, (n, INPUT_DIM), jnp.float32, 0.0, 1.0)

    # float32 everywhere for the exact correctness check.  On v6e/v7x switch
    # to compute_dtype=jnp.bfloat16 once PINN-derivative accuracy is validated.
    out = black_scholes_pinn_forward(x, params)
    out = jax.block_until_ready(out)

    ref = reference_forward(x, params)
    assert out.shape == (n, OUTPUT_DIM), out.shape
    max_err = float(jnp.max(jnp.abs(out - ref)))
    assert jnp.allclose(out, ref, atol=1e-5, rtol=1e-5), max_err

    print("KERNEL_OK")
</pallas_src>

<mosaic_0001>
module attributes {stable_mosaic.version = 11 : i64} {
  func.func @_pinn_kernel(%arg0: i32, %arg1: memref<2x256xf32, #tpu.memory_space<vmem>>, %arg2: memref<64x2xf32, #tpu.memory_space<vmem>>, %arg3: memref<64x1xf32, #tpu.memory_space<vmem>>, %arg4: memref<3x64x64xf32, #tpu.memory_space<vmem>>, %arg5: memref<3x64x1xf32, #tpu.memory_space<vmem>>, %arg6: memref<64x1xf32, #tpu.memory_space<vmem>>, %arg7: memref<1x1xf32, #tpu.memory_space<vmem>>, %arg8: memref<1x256xf32, #tpu.memory_space<vmem>>) attributes {dimension_semantics = [#tpu.dimension_semantics<parallel>], iteration_bounds = array<i64: 4>, scalar_prefetch = 0 : i64, scratch_operands = 0 : i64, tpu.core_type = #tpu.core_type<tc>, window_params = [{transform_indices = @transform_0, window_bounds = array<i64: 2, 256>}, {pipeline_mode = #tpu.pipeline_mode<synchronous>, transform_indices = @transform_1, window_bounds = array<i64: 64, 2>}, {pipeline_mode = #tpu.pipeline_mode<synchronous>, transform_indices = @transform_2, window_bounds = array<i64: 64, 1>}, {pipeline_mode = #tpu.pipeline_mode<synchronous>, transform_indices = @transform_3, window_bounds = array<i64: 3, 64, 64>}, {pipeline_mode = #tpu.pipeline_mode<synchronous>, transform_indices = @transform_4, window_bounds = array<i64: 3, 64, 1>}, {pipeline_mode = #tpu.pipeline_mode<synchronous>, transform_indices = @transform_5, window_bounds = array<i64: 64, 1>}, {pipeline_mode = #tpu.pipeline_mode<synchronous>, transform_indices = @transform_6, window_bounds = array<i64: 1, 1>}, {transform_indices = @transform_7, window_bounds = array<i64: 1, 256>}]} {
    %c0 = arith.constant 0 : index
    %c0_0 = arith.constant 0 : index
    %0 = vector.load %arg1[%c0, %c0_0] : memref<2x256xf32, #tpu.memory_space<vmem>>, vector<2x256xf32>
    %c0_1 = arith.constant 0 : index
    %c0_2 = arith.constant 0 : index
    %1 = vector.load %arg2[%c0_1, %c0_2] : memref<64x2xf32, #tpu.memory_space<vmem>>, vector<64x2xf32>
    %c0_3 = arith.constant 0 : index
    %c0_4 = arith.constant 0 : index
    %2 = vector.load %arg3[%c0_3, %c0_4] : memref<64x1xf32, #tpu.memory_space<vmem>>, vector<64x1xf32>
    %3 = vector.extract_strided_slice %1 {offsets = [0, 0], sizes = [64, 1], strides = [1, 1]} : vector<64x2xf32> to vector<64x1xf32>
    %4 = vector.extract_strided_slice %0 {offsets = [0, 0], sizes = [1, 256], strides = [1, 1]} : vector<2x256xf32> to vector<1x256xf32>
    %5 = vector.broadcast %3 : vector<64x1xf32> to vector<64x256xf32>
    %6 = vector.broadcast %4 : vector<1x256xf32> to vector<64x256xf32>
    %7 = arith.mulf %5, %6 : vector<64x256xf32>
    %8 = vector.extract_strided_slice %1 {offsets = [0, 1], sizes = [64, 1], strides = [1, 1]} : vector<64x2xf32> to vector<64x1xf32>
    %9 = vector.extract_strided_slice %0 {offsets = [1, 0], sizes = [1, 256], strides = [1, 1]} : vector<2x256xf32> to vector<1x256xf32>
    %10 = vector.broadcast %8 : vector<64x1xf32> to vector<64x256xf32>
    %11 = vector.broadcast %9 : vector<1x256xf32> to vector<64x256xf32>
    %12 = arith.mulf %10, %11 : vector<64x256xf32>
    %13 = arith.addf %7, %12 : vector<64x256xf32>
    %14 = vector.broadcast %2 : vector<64x1xf32> to vector<64x256xf32>
    %15 = arith.addf %13, %14 : vector<64x256xf32>
    %16 = math.tanh %15 : vector<64x256xf32>
    %c0_5 = arith.constant 0 : index
    %c0_6 = arith.constant 0 : index
    %c0_7 = arith.constant 0 : index
    %17 = vector.load %arg4[%c0_5, %c0_6, %c0_7] : memref<3x64x64xf32, #tpu.memory_space<vmem>>, vector<1x64x64xf32>
    %18 = vector.shape_cast %17 : vector<1x64x64xf32> to vector<64x64xf32>
    %c0_8 = arith.constant 0 : index
    %c0_9 = arith.constant 0 : index
    %c0_10 = arith.constant 0 : index
    %19 = vector.load %arg5[%c0_8, %c0_9, %c0_10] : memref<3x64x1xf32, #tpu.memory_space<vmem>>, vector<1x64x1xf32>
    %20 = vector.shape_cast %19 : vector<1x64x1xf32> to vector<64x1xf32>
    %cst = arith.constant dense<0.000000e+00> : vector<64x256xf32>
    %21 = tpu.matmul %18, %16, %cst {dimension_numbers = #tpu.dot_dimension_numbers<[1], [0], [0], [1], [0, 0, 1, 1], [], []>} : vector<64x64xf32>, vector<64x256xf32>, vector<64x256xf32> -> vector<64x256xf32>
    %22 = vector.broadcast %20 : vector<64x1xf32> to vector<64x256xf32>
    %23 = arith.addf %21, %22 : vector<64x256xf32>
    %24 = math.tanh %23 : vector<64x256xf32>
    %c1 = arith.constant 1 : index
    %c0_11 = arith.constant 0 : index
    %c0_12 = arith.constant 0 : index
    %25 = vector.load %arg4[%c1, %c0_11, %c0_12] : memref<3x64x64xf32, #tpu.memory_space<vmem>>, vector<1x64x64xf32>
    %26 = vector.shape_cast %25 : vector<1x64x64xf32> to vector<64x64xf32>
    %c1_13 = arith.constant 1 : index
    %c0_14 = arith.constant 0 : index
    %c0_15 = arith.constant 0 : index
    %27 = vector.load %arg5[%c1_13, %c0_14, %c0_15] : memref<3x64x1xf32, #tpu.memory_space<vmem>>, vector<1x64x1xf32>
    %28 = vector.shape_cast %27 : vector<1x64x1xf32> to vector<64x1xf32>
    %cst_16 = arith.constant dense<0.000000e+00> : vector<64x256xf32>
    %29 = tpu.matmul %26, %24, %cst_16 {dimension_numbers = #tpu.dot_dimension_numbers<[1], [0], [0], [1], [0, 0, 1, 1], [], []>} : vector<64x64xf32>, vector<64x256xf32>, vector<64x256xf32> -> vector<64x256xf32>
    %30 = vector.broadcast %28 : vector<64x1xf32> to vector<64x256xf32>
    %31 = arith.addf %29, %30 : vector<64x256xf32>
    %32 = math.tanh %31 : vector<64x256xf32>
    %c2 = arith.constant 2 : index
    %c0_17 = arith.constant 0 : index
    %c0_18 = arith.constant 0 : index
    %33 = vector.load %arg4[%c2, %c0_17, %c0_18] : memref<3x64x64xf32, #tpu.memory_space<vmem>>, vector<1x64x64xf32>
    %34 = vector.shape_cast %33 : vector<1x64x64xf32> to vector<64x64xf32>
    %c2_19 = arith.constant 2 : index
    %c0_20 = arith.constant 0 : index
    %c0_21 = arith.constant 0 : index
    %35 = vector.load %arg5[%c2_19, %c0_20, %c0_21] : memref<3x64x1xf32, #tpu.memory_space<vmem>>, vector<1x64x1xf32>
    %36 = vector.shape_cast %35 : vector<1x64x1xf32> to vector<64x1xf32>
    %cst_22 = arith.constant dense<0.000000e+00> : vector<64x256xf32>
    %37 = tpu.matmul %34, %32, %cst_22 {dimension_numbers = #tpu.dot_dimension_numbers<[1], [0], [0], [1], [0, 0, 1, 1], [], []>} : vector<64x64xf32>, vector<64x256xf32>, vector<64x256xf32> -> vector<64x256xf32>
    %38 = vector.broadcast %36 : vector<64x1xf32> to vector<64x256xf32>
    %39 = arith.addf %37, %38 : vector<64x256xf32>
    %40 = math.tanh %39 : vector<64x256xf32>
    %c0_23 = arith.constant 0 : index
    %c0_24 = arith.constant 0 : index
    %41 = vector.load %arg6[%c0_23, %c0_24] : memref<64x1xf32, #tpu.memory_space<vmem>>, vector<64x1xf32>
    %42 = vector.broadcast %41 : vector<64x1xf32> to vector<64x256xf32>
    %43 = arith.mulf %42, %40 : vector<64x256xf32>
    %cst_25 = arith.constant dense<0.000000e+00> : vector<256xf32>
    %44 = vector.multi_reduction <add>, %43, %cst_25 [0] : vector<64x256xf32> to vector<256xf32>
    %45 = vector.shape_cast %44 : vector<256xf32> to vector<1x256xf32>
    %c0_26 = arith.constant 0 : index
    %c0_27 = arith.constant 0 : index
    %46 = vector.load %arg7[%c0_26, %c0_27] : memref<1x1xf32, #tpu.memory_space<vmem>>, vector<1x1xf32>
    %47 = vector.broadcast %46 : vector<1x1xf32> to vector<1x256xf32>
    %48 = arith.addf %45, %47 : vector<1x256xf32>
    %c0_28 = arith.constant 0 : index
    %c0_29 = arith.constant 0 : index
    %49 = vector.load %arg8[%c0_28, %c0_29] : memref<1x256xf32, #tpu.memory_space<vmem>>, vector<1x256xf32>
    tpu.vector_store %arg8[%c0_28, %c0_29], %48 {strides = array<i32>} : memref<1x256xf32, #tpu.memory_space<vmem>>, vector<1x256xf32>,
    return
  }
  func.func @transform_0(%arg0: i32) -> (i32, i32) {
    %c0_i32 = arith.constant 0 : i32
    %c0_i32_0 = arith.constant 0 : i32
    return %c0_i32, %arg0 : i32, i32
  }
  func.func @transform_1(%arg0: i32) -> (i32, i32) {
    %c0_i32 = arith.constant 0 : i32
    %c0_i32_0 = arith.constant 0 : i32
    %c0_i32_1 = arith.constant 0 : i32
    return %c0_i32, %c0_i32_0 : i32, i32
  }
  func.func @transform_2(%arg0: i32) -> (i32, i32) {
    %c0_i32 = arith.constant 0 : i32
    %c0_i32_0 = arith.constant 0 : i32
    %c0_i32_1 = arith.constant 0 : i32
    return %c0_i32, %c0_i32_0 : i32, i32
  }
  func.func @transform_3(%arg0: i32) -> (i32, i32, i32) {
    %c0_i32 = arith.constant 0 : i32
    %c0_i32_0 = arith.constant 0 : i32
    %c0_i32_1 = arith.constant 0 : i32
    %c0_i32_2 = arith.constant 0 : i32
    return %c0_i32, %c0_i32_0, %c0_i32_1 : i32, i32, i32
  }
  func.func @transform_4(%arg0: i32) -> (i32, i32, i32) {
    %c0_i32 = arith.constant 0 : i32
    %c0_i32_0 = arith.constant 0 : i32
    %c0_i32_1 = arith.constant 0 : i32
    %c0_i32_2 = arith.constant 0 : i32
    return %c0_i32, %c0_i32_0, %c0_i32_1 : i32, i32, i32
  }
  func.func @transform_5(%arg0: i32) -> (i32, i32) {
    %c0_i32 = arith.constant 0 : i32
    %c0_i32_0 = arith.constant 0 : i32
    %c0_i32_1 = arith.constant 0 : i32
    return %c0_i32, %c0_i32_0 : i32, i32
  }
  func.func @transform_6(%arg0: i32) -> (i32, i32) {
    %c0_i32 = arith.constant 0 : i32
    %c0_i32_0 = arith.constant 0 : i32
    %c0_i32_1 = arith.constant 0 : i32
    return %c0_i32, %c0_i32_0 : i32, i32
  }
  func.func @transform_7(%arg0: i32) -> (i32, i32) {
    %c0_i32 = arith.constant 0 : i32
    %c0_i32_0 = arith.constant 0 : i32
    return %c0_i32, %arg0 : i32, i32
  }
}

</mosaic_0001>

<bundles_post_ra>
// kernel: black_scholes_pinn_forward.1
= control target key start
LH: loop header
LB: loop body
LE: loop exit
PB: predicated region body
PF: predicated region fallthrough
CT: control target
= control target key end

     0   :  { %s1509_s26 = smov 0   ;;  %s1856_s0 = inlined_call_operand.vmem [shape: f32[2,1024], index: 0, kind: input, shape index: {}]   ;;  %s1857_s1 = inlined_call_operand.vmem [shape: f32[64,2], index: 1, kind: input, shape index: {}]   ;;  %s1858_s2 = inlined_call_operand.vmem [shape: f32[64,1], index: 2, kind: input, shape index: {}]   ;;  %s1859_s3 = inlined_call_operand.vmem [shape: f32[3,64,64], index: 3, kind: input, shape index: {}]   ;;  %s1860_s4 = inlined_call_operand.vmem [shape: f32[3,64,1], index: 4, kind: input, shape index: {}]   ;;  %s1861_s5 = inlined_call_operand.vmem [shape: f32[64,1], index: 5, kind: input, shape index: {}]   ;;  %s1862_s6 = inlined_call_operand.<no memory space> [shape: f32[1,1], index: 6, kind: input, shape index: {}]   ;;  %s1863_s7 = inlined_call_operand.vmem [shape: f32[1,1024], index: 7, kind: output, shape index: {}]  }
   0x1   :  { %v12_v0 = vstv %s1862_s6 }
   0x2   :  { %13 = vst [vmem:[#allocation2] sm:$0x1] %v12_v0 }
   0x3 LB: > { %s1203_s27 = sadd.s32 4294967295, %s1462_s26   ;;  %p1207_p0 = scmp.ge.s32.totalorder %s1462_s26, 1  ;;  %s1462_s26 = sphi %s1509_s26, %s19_s26  }
   0x4   : > { %p240_p1 = scmp.lt.s32.totalorder %s1462_s26, 5 }
   0x6   : > { %p241_p2 = pnand %p1207_p0, %p240_p1 }
   0x7   : > { %s1208_s22 = sshll.u32 (!%p241_p2), %s1203_s27, 1 }
   0x8   : > { %244 = sbr.rel (%p241_p2) target bundleno = 810 (0x32a), region = 48  ;;  %p272_p3 = scmp.lt.s32.totalorder (!%p241_p2), %s1208_s22, 7 }
   0xd   : > { %v290_v1 = vld [vmem:[%s1857_s1 + $0x38] sm:$0xff]  ;;  %v289_v2 = vld [vmem:[%s1857_s1 + $0x30] sm:$0xff]  ;;  %v288_v3 = vld [vmem:[%s1857_s1 + $0x28] sm:$0xff]  ;;  %v1464_v4 = vmov 0   ;;  %v1465_v5 = vmov 1   ;;  %s1865_s22 = smov (!%p272_p3, %s1208_s22), 7 }
   0xe   : > { %1323 = vset.pattern.permute.xlu2 %v1464_v4  ;;  %1321 = vset.pattern.permute.xlu1 %v1464_v4  ;;  %v287_v6 = vld [vmem:[%s1857_s1 + $0x20] sm:$0xff]  ;;  %v298_v7 = vld [vmem:[%s1858_s2 + $0x38] sm:$0xff]  ;;  %v297_v9 = vld [vmem:[%s1858_s2 + $0x30] sm:$0xff]  ;;  %s1209_s12 = sshll.u32 %s1865_s22, 1  ;;  %vm560_vm0 = vcmask 523264   ;;  %vm1145_vm1 = vcmask 1040384   ;;  %s280_s23 = scalar_lea.vmem %s1863_s7, %s1865_s22 }
   0xf   : > { %1319 = vset.pattern.permute.xlu0 %v1464_v4  ;;  %331 = vperm.xlu1 %1321, %v289_v2   ;;  %v286_v8 = vld [vmem:[%s1857_s1 + $0x18] sm:$0xff]  ;;  %v285_v10 = vld [vmem:[%s1857_s1 + $0x10] sm:$0xff]  ;;  %v296_v11 = vld [vmem:[%s1858_s2 + $0x28] sm:$0xff]  ;;  %s275_s15 = scalar_lea.vmem %s1856_s0, %s1209_s12 }
  0x10   : > { %336 = vperm.xlu0 %1319, %v290_v1   ;;  %326 = vperm.xlu2 %1323, %v288_v3   ;;  %v284_v12 = vld [vmem:[%s1857_s1 + $0x8] sm:$0xff]  ;;  %v295_v13 = vld [vmem:[%s1858_s2 + $0x20] sm:$0xff]  ;;  %v294_v15 = vld [vmem:[%s1858_s2 + $0x18] sm:$0xff] }
  0x11   : > { %v283_v14 = vld [vmem:[%s1857_s1] sm:$0xff]  ;;  %v293_v16 = vld [vmem:[%s1858_s2 + $0x10] sm:$0xff]  ;;  %v292_v18 = vld [vmem:[%s1858_s2 + $0x8] sm:$0xff] }
  0x12   : > { %v291_v17 = vld [vmem:[%s1858_s2] sm:$0xff]  ;;  %v519_v19 = vld [vmem:[%s1860_s4 + $0x38] sm:$0xff]  ;;  %v518_v21 = vld [vmem:[%s1860_s4 + $0x30] sm:$0xff] }
  0x13   : > { %v515_v20 = vld [vmem:[%s1860_s4 + $0x18] sm:$0xff]  ;;  %v517_v22 = vld [vmem:[%s1860_s4 + $0x28] sm:$0xff]  ;;  %v512_v23 = vld [vmem:[%s1860_s4] sm:$0xff] }
  0x14   : > { %v516_v24 = vld [vmem:[%s1860_s4 + $0x20] sm:$0xff]  ;;  %v514_v25 = vld [vmem:[%s1860_s4 + $0x10] sm:$0xff]  ;;  %v1240_v26 = vld [vmem:[%s1860_s4 + $0x68] sm:$0xff] }
  0x15   : > { %v513_v27 = vld [vmem:[%s1860_s4 + $0x8] sm:$0xff]  ;;  %v1242_v28 = vld [vmem:[%s1860_s4 + $0x78] sm:$0xff]  ;;  %v1237_v29 = vld [vmem:[%s1860_s4 + $0x50] sm:$0xff] }
  0x16   : > { %v1241_v30 = vld [vmem:[%s1860_s4 + $0x70] sm:$0xff]  ;;  %v1239_v31 = vld [vmem:[%s1860_s4 + $0x60] sm:$0xff]  ;;  %v1238_v33 = vld [vmem:[%s1860_s4 + $0x58] sm:$0xff] }
  0x17   : > { %1322 = vset.pattern.permute.xlu1 %v1465_v5  ;;  %v1267_v32 = vld [vmem:[%s1860_s4 + $0x80] sm:$0xff]  ;;  %v1236_v35 = vld [vmem:[%s1860_s4 + $0x48] sm:$0xff]  ;;  %v1270_v36 = vld [vmem:[%s1860_s4 + $0x98] sm:$0xff] }
  0x18   : > { %1320 = vset.pattern.permute.xlu0 %v1465_v5  ;;  %1324 = vset.pattern.permute.xlu2 %v1465_v5  ;;  %v1235_v37 = vld [vmem:[%s1860_s4 + $0x40] sm:$0xff]  ;;  %v1268_v39 = vld [vmem:[%s1860_s4 + $0x88] sm:$0xff]  ;;  %v1269_v41 = vld [vmem:[%s1860_s4 + $0x90] sm:$0xff] }
  0x19   : > { %391 = vperm.xlu0 %1320, %v290_v1   ;;  %387 = vperm.xlu1 %1322, %v289_v2   ;;  %v1043_v40 = vld [vmem:[%s1861_s5] sm:$0xff]  ;;  %v1045_v45 = vld [vmem:[%s1861_s5 + $0x10] sm:$0xff]  ;;  %v1272_v47 = vld [vmem:[%s1860_s4 + $0xa8] sm:$0xff] }
  0x1a   : > { %383 = vperm.xlu2 %1324, %v288_v3   ;;  %v1271_v44 = vld [vmem:[%s1860_s4 + $0xa0] sm:$0xff]  ;;  %v1044_v61 = vld [vmem:[%s1861_s5 + $0x8] sm:$0xff]  ;;  %v1273_v63 = vld [vmem:[%s1860_s4 + $0xb0] sm:$0xff] }
  0x1b   : > { %v282_v46 = vld [vmem:[%s275_s15] sm:$0xf] }
  0x1c   : > { %v394_v48 = vperm.slane %v282_v46, 1  ;;  %v395_v49 = vperm.slane %v282_v46, 3  ;;  %v340_v51 = vperm.slane %v282_v46, 0  ;;  %v341_v52 = vperm.slane %v282_v46, 2  ;;  %v1047_v62 = vld [vmem:[%s1861_s5 + $0x20] sm:$0xff] }
  0x1e   : > { %v1651_v55 = vperm.slane %v394_v48, 1  ;;  %v1653_v56 = vperm.slane %v395_v49, 1  ;;  %v1655_v57 = vperm.slane %v340_v51, 0  ;;  %v1657_v58 = vperm.slane %v341_v52, 0 }
  0x21   : > { %1325 = vset.pattern.permute.xlu1 %v1464_v4  ;;  %379 = vperm.xlu0 %1320, %v287_v6  }
  0x22   : > { %1326 = vset.pattern.permute.xlu2 %v1464_v4  ;;  %469 = vperm.xlu1 %1325, %v298_v7  }
  0x23   : > { %321 = vperm.xlu2 %1326, %v287_v6  }
  0x29   : > { %375 = vperm.xlu0 %1320, %v286_v8  }
  0x2a   : > { %464 = vperm.xlu1 %1325, %v297_v9  }
  0x2b   : > { %316 = vperm.xlu2 %1326, %v286_v8  }
  0x31   : > { %371 = vperm.xlu0 %1320, %v285_v10  }
  0x32   : > { %459 = vperm.xlu1 %1325, %v296_v11   ;;  %v1274_v11 = vld [vmem:[%s1860_s4 + $0xb8] sm:$0xff] }
  0x33   : > { %311 = vperm.xlu2 %1326, %v285_v10  }
  0x39   : > { %367 = vperm.xlu0 %1320, %v284_v12  }
  0x3a   : > { %454 = vperm.xlu1 %1325, %v295_v13   ;;  %v1046_v13 = vld [vmem:[%s1861_s5 + $0x18] sm:$0xff] }
  0x3b   : > { %306 = vperm.xlu2 %1326, %v284_v12   ;;  %v1050_v12 = vld [vmem:[%s1861_s5 + $0x38] sm:$0xff] }
  0x41   : > { %363 = vperm.xlu0 %1320, %v283_v14  }
  0x42   : > { %449 = vperm.xlu1 %1325, %v294_v15  }
  0x43   : > { %301 = vperm.xlu2 %1326, %v283_v14  }
  0x49   : > { %1327 = vset.pattern.permute.xlu0 %v1464_v4 }
  0x4a   : > { %444 = vperm.xlu1 %1325, %v293_v16   ;;  %434 = vperm.xlu0 %1327, %v291_v17  }
  0x4b   : > { %439 = vperm.xlu2 %1326, %v292_v18  }
  0x52   : > { %557 = vperm.xlu1 %1325, %v519_v19   ;;  %537 = vperm.xlu0 %1327, %v515_v20  }
  0x53   : > { %552 = vperm.xlu2 %1326, %v518_v21  }
  0x5a   : > { %547 = vperm.xlu1 %1325, %v517_v22   ;;  %522 = vperm.xlu0 %1327, %v512_v23  }
  0x5b   : > { %542 = vperm.xlu2 %1326, %v516_v24  }
  0x62   : > { %532 = vperm.xlu1 %1325, %v514_v25   ;;  %728 = vperm.xlu0 %1327, %v1240_v26  }
  0x63   : > { %527 = vperm.xlu2 %1326, %v513_v27  }
  0x6a   : > { %738 = vperm.xlu1 %1325, %v1242_v28   ;;  %713 = vperm.xlu0 %1327, %v1237_v29   ;;  %v1610_v34 = vpop.permute.xlu2 %326  ;;  %v1048_v29 = vld [vmem:[%s1861_s5 + $0x28] sm:$0xff] }
  0x6b   : > { %733 = vperm.xlu2 %1326, %v1241_v30   ;;  %v356_v25 = vmul.f32 %v1655_v57, %v1610_v34  ;;  %v357_v26 = vmul.f32 %v1657_v58, %v1610_v34  ;;  %v1049_v30 = vld [vmem:[%s1861_s5 + $0x30] sm:$0xff] }
  0x72   : > { %723 = vperm.xlu1 %1325, %v1239_v31   ;;  %883 = vperm.xlu0 %1327, %v1267_v32  }
  0x73   : > { %718 = vperm.xlu2 %1326, %v1238_v33  }
  0x74   : > { %v1625_v38 = vpop.permute.xlu2 %383 }
  0x75   : > { %v410_v27 = vmul.f32 %v1651_v55, %v1625_v38  ;;  %v411_v28 = vmul.f32 %v1653_v56, %v1625_v38 }
  0x77   : > { %v426_v32 = vadd.f32 %v410_v27, %v356_v25  ;;  %v427_v33 = vadd.f32 %v411_v28, %v357_v26 }
  0x7a   : > { %708 = vperm.xlu1 %1325, %v1236_v35   ;;  %898 = vperm.xlu0 %1327, %v1270_v36  }
  0x7b   : > { %703 = vperm.xlu2 %1326, %v1235_v37  }
  0x7d   : > { %v1649_v50 = vpop.permute.xlu2 %321 }
  0x81   : > { %v332_v42 = vpop.permute.xlu1 %331 }
  0x82   : > { %888 = vperm.xlu1 %1325, %v1268_v39   ;;  %1053 = vperm.xlu0 %1327, %v1043_v40   ;;  %v337_v43 = vpop.permute.xlu0 %336  ;;  %v358_v14 = vmul.f32 %v1655_v57, %v332_v42  ;;  %v359_v15 = vmul.f32 %v1657_v58, %v332_v42  ;;  %v354_v39 = vmul.f32 %v1655_v57, %v1649_v50 }
  0x83   : > { %893 = vperm.xlu2 %1326, %v1269_v41   ;;  %v360_v0 = vmul.f32 %v1655_v57, %v337_v43  ;;  %v361_v1 = vmul.f32 %v1657_v58, %v337_v43  ;;  %v355_v40 = vmul.f32 %v1657_v58, %v1649_v50 }
  0x85   : > { %v1672_v2 = vpop.permute.xlu2 %316 }
  0x8a   : > { %903 = vperm.xlu1 %1325, %v1271_v44   ;;  %1063 = vperm.xlu0 %1327, %v1045_v45   ;;  %v1133_v44 = vld [vmem:[#allocation2] sm:$0x1] }
  0x8b   : > { %908 = vperm.xlu2 %1326, %v1272_v47   ;;  %v392_v53 = vpop.permute.xlu0 %391  ;;  %v388_v54 = vpop.permute.xlu1 %387 }
  0x8c   : > { %v414_v59 = vmul.f32 %v1651_v55, %v392_v53  ;;  %v415_v60 = vmul.f32 %v1653_v56, %v392_v53  ;;  %v412_v9 = vmul.f32 %v1651_v55, %v388_v54  ;;  %v413_v10 = vmul.f32 %v1653_v56, %v388_v54 }
  0x8d   : > { %v1687_v21 = vpop.permute.xlu2 %311 }
  0x8e   : > { %v430_v4 = vadd.f32 %v414_v59, %v360_v0  ;;  %v431_v5 = vadd.f32 %v415_v60, %v361_v1  ;;  %v428_v17 = vadd.f32 %v412_v9, %v358_v14  ;;  %v429_v18 = vadd.f32 %v413_v10, %v359_v15 }
  0x8f   : > { %v352_v59 = vmul.f32 %v1655_v57, %v1672_v2  ;;  %v353_v60 = vmul.f32 %v1657_v58, %v1672_v2 }
  0x92   : > { %1058 = vperm.xlu1 %1325, %v1044_v61   ;;  %1073 = vperm.xlu0 %1327, %v1047_v62  }
  0x93   : > { %913 = vperm.xlu2 %1326, %v1273_v63   ;;  %v380_v3 = vpop.permute.xlu0 %379 }
  0x94   : > { %v470_v6 = vpop.permute.xlu1 %469  ;;  %v408_v41 = vmul.f32 %v1651_v55, %v380_v3  ;;  %v409_v42 = vmul.f32 %v1653_v56, %v380_v3 }
  0x95   : > { %v486_v7 = vadd.f32 %v470_v6, %v430_v4  ;;  %v487_v8 = vadd.f32 %v470_v6, %v431_v5  ;;  %v307_v43 = vpop.permute.xlu2 %306 }
  0x96   : > { %v424_v46 = vadd.f32 %v408_v41, %v354_v39  ;;  %v425_v47 = vadd.f32 %v409_v42, %v355_v40  ;;  %v348_v9 = vmul.f32 %v1655_v57, %v307_v43  ;;  %v505_v39 = vld [vmem:[%s1859_s3 + $0x8] sm:$0xff]  ;;  %v506_v41 = vld [vmem:[%s1859_s3 + $0x10] sm:$0xff] }
  0x97   : > { %1328 = vtanh.f32 %v486_v7  ;;  %v509_v40 = vld [vmem:[%s1859_s3 + $0x28] sm:$0xff]  ;;  %v510_v42 = vld [vmem:[%s1859_s3 + $0x30] sm:$0xff] }
  0x98   : > { %1330 = vtanh.f32 %v487_v8 }
  0x9a   : > { %918 = vperm.xlu1 %1325, %v1274_v11   ;;  %1088 = vperm.xlu0 %1327, %v1050_v12   ;;  %v349_v11 = vmul.f32 %v1657_v58, %v307_v43  ;;  %v350_v12 = vmul.f32 %v1655_v57, %v1687_v21  ;;  %v507_v43 = vld [vmem:[%s1859_s3 + $0x18] sm:$0xff] }
  0x9b   : > { %1068 = vperm.xlu2 %1326, %v1046_v13   ;;  %v376_v16 = vpop.permute.xlu0 %375  ;;  %v351_v13 = vmul.f32 %v1657_v58, %v1687_v21 }
  0x9c   : > { %v465_v19 = vpop.permute.xlu1 %464  ;;  %v406_v50 = vmul.f32 %v1651_v55, %v376_v16  ;;  %v407_v54 = vmul.f32 %v1653_v56, %v376_v16 }
  0x9d   : > { %v1329_v20 = vpop.eup %1328  ;;  %v484_v22 = vadd.f32 %v465_v19, %v428_v17  ;;  %v485_v23 = vadd.f32 %v465_v19, %v429_v18  ;;  %v302_v61 = vpop.permute.xlu2 %301 }
  0x9e   : > { %v1331_v24 = vpop.eup %1330  ;;  %593 = vmatpush.msra.mxu0 %v1329_v20  ;;  %1293 = vmatpush.msra.mxu2 %v1329_v20  ;;  %v422_v63 = vadd.f32 %v406_v50, %v352_v59  ;;  %v423_v0 = vadd.f32 %v407_v54, %v353_v60  ;;  %v346_v18 = vmul.f32 %v1655_v57, %v302_v61 }
  0x9f   : > { %1332 = vtanh.f32 %v484_v22  ;;  %634 = vmatpush.msra.mxu1 %v1331_v24  ;;  %1301 = vmatpush.msra.mxu3 %v1331_v24 }
  0xa0   : > { %1334 = vtanh.f32 %v485_v23  ;;  %v347_v23 = vmul.f32 %v1657_v58, %v302_v61 }
  0xa2   : > { %1078 = vperm.xlu1 %1325, %v1048_v29  }
  0xa3   : > { %1083 = vperm.xlu2 %1326, %v1049_v30   ;;  %v372_v31 = vpop.permute.xlu0 %371 }
  0xa4   : > { %v460_v34 = vpop.permute.xlu1 %459  ;;  %v404_v10 = vmul.f32 %v1651_v55, %v372_v31  ;;  %v405_v2 = vmul.f32 %v1653_v56, %v372_v31 }
  0xa5   : > { %v1333_v35 = vpop.eup %1332  ;;  %v482_v36 = vadd.f32 %v460_v34, %v426_v32  ;;  %v483_v37 = vadd.f32 %v460_v34, %v427_v33  ;;  %v440_v19 = vpop.permute.xlu2 %439 }
  0xa6   : > { %v1335_v38 = vpop.eup %1334  ;;  %594 = vmatpush.msra.mxu0 %v1333_v35  ;;  %1294 = vmatpush.msra.mxu2 %v1333_v35  ;;  %v420_v20 = vadd.f32 %v404_v10, %v350_v12  ;;  %v421_v22 = vadd.f32 %v405_v2, %v351_v13 }
  0xa7   : > { %1336 = vtanh.f32 %v482_v36  ;;  %635 = vmatpush.msra.mxu1 %v1335_v38  ;;  %1302 = vmatpush.msra.mxu3 %v1335_v38  ;;  %v504_v36 = vld [vmem:[%s1859_s3] sm:$0xff] }
  0xa8   : > { %1338 = vtanh.f32 %v483_v37  ;;  %v508_v37 = vld [vmem:[%s1859_s3 + $0x20] sm:$0xff] }
  0xaa   : > { %1136 = vperm.xlu1 %1325, %v1133_v44   ;;  %v511_v44 = vld [vmem:[%s1859_s3 + $0x38] sm:$0xff] }
  0xab   : > { %v368_v45 = vpop.permute.xlu0 %367 }
  0xac   : > { %v455_v48 = vpop.permute.xlu1 %454  ;;  %v402_v4 = vmul.f32 %v1651_v55, %v368_v45  ;;  %v403_v8 = vmul.f32 %v1653_v56, %v368_v45 }
  0xad   : > { %v1337_v49 = vpop.eup %1336  ;;  %v480_v51 = vadd.f32 %v455_v48, %v424_v46  ;;  %v481_v52 = vadd.f32 %v455_v48, %v425_v47  ;;  %v553_v54 = vpop.permute.xlu2 %552 }
  0xae   : > { %v1339_v53 = vpop.eup %1338  ;;  %595 = vmatpush.msra.mxu0 %v1337_v49  ;;  %1295 = vmatpush.msra.mxu2 %v1337_v49  ;;  %v418_v14 = vadd.f32 %v402_v4, %v348_v9  ;;  %v419_v16 = vadd.f32 %v403_v8, %v349_v11 }
  0xaf   : > { %1340 = vtanh.f32 %v480_v51  ;;  %636 = vmatpush.msra.mxu1 %v1339_v53  ;;  %1303 = vmatpush.msra.mxu3 %v1339_v53 }
  0xb0   : > { %1342 = vtanh.f32 %v481_v52  ;;  %v474_v27 = vadd.f32 %v440_v19, %v418_v14  ;;  %v475_v31 = vadd.f32 %v440_v19, %v419_v16 }
  0xb3   : > { %v364_v62 = vpop.permute.xlu0 %363 }
  0xb4   : > { %v450_v1 = vpop.permute.xlu1 %449  ;;  %v400_v15 = vmul.f32 %v1651_v55, %v364_v62  ;;  %v401_v17 = vmul.f32 %v1653_v56, %v364_v62 }
  0xb5   : > { %v1341_v3 = vpop.eup %1340  ;;  %v478_v5 = vadd.f32 %v450_v1, %v422_v63  ;;  %v479_v6 = vadd.f32 %v450_v1, %v423_v0  ;;  %v543_v0 = vpop.permute.xlu2 %542 }
  0xb6   : > { %v1343_v7 = vpop.eup %1342  ;;  %596 = vmatpush.msra.mxu0 %v1341_v3  ;;  %1296 = vmatpush.msra.mxu2 %v1341_v3  ;;  %v416_v21 = vadd.f32 %v400_v15, %v346_v18  ;;  %v417_v55 = vadd.f32 %v401_v17, %v347_v23 }
  0xb7   : > { %1344 = vtanh.f32 %v478_v5  ;;  %637 = vmatpush.msra.mxu1 %v1343_v7  ;;  %1304 = vmatpush.msra.mxu3 %v1343_v7 }
  0xb8   : > { %1346 = vtanh.f32 %v479_v6 }
  0xbc   : > { %v445_v24 = vpop.permute.xlu1 %444  ;;  %v435_v25 = vpop.permute.xlu0 %434 }
  0xbd   : > { %v1345_v26 = vpop.eup %1344  ;;  %v476_v28 = vadd.f32 %v445_v24, %v420_v20  ;;  %v477_v29 = vadd.f32 %v445_v24, %v421_v22  ;;  %v472_v56 = vadd.f32 %v435_v25, %v416_v21  ;;  %v473_v57 = vadd.f32 %v435_v25, %v417_v55  ;;  %v528_v20 = vpop.permute.xlu2 %527 }
  0xbe   : > { %v1347_v30 = vpop.eup %1346  ;;  %597 = vmatpush.msra.mxu0 %v1345_v26  ;;  %1297 = vmatpush.msra.mxu2 %v1345_v26 }
  0xbf   : > { %1348 = vtanh.f32 %v476_v28  ;;  %638 = vmatpush.msra.mxu1 %v1347_v30  ;;  %1305 = vmatpush.msra.mxu3 %v1347_v30 }
  0xc0   : > { %1350 = vtanh.f32 %v477_v29 }
  0xc1   : > { %1352 = vtanh.f32 %v474_v27 }
  0xc2   : > { %1354 = vtanh.f32 %v475_v31 }
  0xc3   : > { %1356 = vtanh.f32 %v472_v56 }
  0xc4   : > { %1358 = vtanh.f32 %v473_v57  ;;  %v558_v50 = vpop.permute.xlu1 %557  ;;  %v538_v6 = vpop.permute.xlu0 %537 }
  0xc5   : > { %v1349_v58 = vpop.eup %1348 }
  0xc6   : > { %v1351_v32 = vpop.eup %1350  ;;  %598 = vmatpush.msra.mxu0 %v1349_v58  ;;  %1298 = vmatpush.msra.mxu2 %v1349_v58 }
  0xc7   : > { %v1353_v33 = vpop.eup %1352  ;;  %639 = vmatpush.msra.mxu1 %v1351_v32  ;;  %1306 = vmatpush.msra.mxu3 %v1351_v32 }
  0xc8   : > { %v1355_v34 = vpop.eup %1354  ;;  %599 = vmatpush.msra.mxu0 %v1353_v33  ;;  %1299 = vmatpush.msra.mxu2 %v1353_v33 }
  0xc9   : > { %v1357_v35 = vpop.eup %1356  ;;  %640 = vmatpush.msra.mxu1 %v1355_v34  ;;  %1307 = vmatpush.msra.mxu3 %v1355_v34 }
  0xca   : > { %v1359_v38 = vpop.eup %1358  ;;  %600 = vmatpush.msra.mxu0 %v1357_v35  ;;  %1300 = vmatpush.msra.mxu2 %v1357_v35  ;;  %v1227_v35 = vld [vmem:[%s1859_s3 + $0x40] sm:$0xff] }
  0xcb   : > { %641 = vmatpush.msra.mxu1 %v1359_v38  ;;  %1308 = vmatpush.msra.mxu3 %v1359_v38  ;;  %v1228_v38 = vld [vmem:[%s1859_s3 + $0x48] sm:$0xff] }
  0xcc   : > { %1211 = vmatmul.msk.f32.vlgmr.msra.gmra.mxu0 %vm560_vm0, %v504_v36  ;;  %1215 = vmatmul.msk.f32.vlgmr.msra.gmra.mxu2 %vm560_vm0, %v508_v37  ;;  %v548_v63 = vpop.permute.xlu1 %547  ;;  %v523_v26 = vpop.permute.xlu0 %522 }
  0xcd   : > { %1219 = vmatmul.msk.f32.vlgmr.msra.gmra.mxu1 %vm560_vm0, %v504_v36  ;;  %1223 = vmatmul.msk.f32.vlgmr.msra.gmra.mxu3 %vm560_vm0, %v508_v37 }
  0xd4   : > { %1212 = vmatmul.msk.f32.gmra.mxu0 %vm560_vm0, %v505_v39  ;;  %1216 = vmatmul.msk.f32.gmra.mxu2 %vm560_vm0, %v509_v40  ;;  %v533_v15 = vpop.permute.xlu1 %532 }
  0xd5   : > { %1220 = vmatmul.msk.f32.gmra.mxu1 %vm560_vm0, %v505_v39  ;;  %1224 = vmatmul.msk.f32.gmra.mxu3 %vm560_vm0, %v509_v40  ;;  %v1229_v39 = vld [vmem:[%s1859_s3 + $0x50] sm:$0xff]  ;;  %v1230_v40 = vld [vmem:[%s1859_s3 + $0x58] sm:$0xff] }
  0xdc   : > { %1213 = vmatmul.msk.f32.gmra.mxu0 %vm560_vm0, %v506_v41  ;;  %1217 = vmatmul.msk.f32.gmra.mxu2 %vm560_vm0, %v510_v42 }
  0xdd   : > { %1221 = vmatmul.msk.f32.gmra.mxu1 %vm560_vm0, %v506_v41  ;;  %1225 = vmatmul.msk.f32.gmra.mxu3 %vm560_vm0, %v510_v42  ;;  %v1231_v41 = vld [vmem:[%s1859_s3 + $0x60] sm:$0xff]  ;;  %v1232_v42 = vld [vmem:[%s1859_s3 + $0x68] sm:$0xff] }
  0xe4   : > { %1214 = vmatmul.msk.f32.gmra.mxu0 %vm560_vm0, %v507_v43  ;;  %1218 = vmatmul.msk.f32.gmra.mxu2 %vm560_vm0, %v511_v44 }
  0xe5   : > { %1222 = vmatmul.msk.f32.gmra.mxu1 %vm560_vm0, %v507_v43  ;;  %1226 = vmatmul.msk.f32.gmra.mxu3 %vm560_vm0, %v511_v44  ;;  %v1233_v43 = vld [vmem:[%s1859_s3 + $0x70] sm:$0xff]  ;;  %v1234_v44 = vld [vmem:[%s1859_s3 + $0x78] sm:$0xff] }
 0x149   : > { %v602_v45 = vpop.f32.mrf.mxu0 }
 0x14a   : > { %v643_v46 = vpop.f32.mrf.mxu1  ;;  %v603_v29 = vadd.f32 %v602_v45, %v523_v26 }
 0x14b   : > { %v644_v30 = vadd.f32 %v643_v46, %v523_v26 }
 0x14f   : > { %v614_v47 = vpop.f32.mrf.mxu2 }
 0x150   : > { %v655_v48 = vpop.f32.mrf.mxu3  ;;  %v615_v11 = vadd.f32 %v614_v47, %v543_v0 }
 0x151   : > { %v605_v49 = vpop.f32.mrf.mxu0  ;;  %v656_v13 = vadd.f32 %v655_v48, %v543_v0 }
 0x152   : > { %v646_v52 = vpop.f32.mrf.mxu1  ;;  %v606_v24 = vadd.f32 %v605_v49, %v528_v20 }
 0x153   : > { %v647_v27 = vadd.f32 %v646_v52, %v528_v20 }
 0x157   : > { %v617_v51 = vpop.f32.mrf.mxu2 }
 0x158   : > { %v658_v53 = vpop.f32.mrf.mxu3  ;;  %v618_v9 = vadd.f32 %v617_v51, %v548_v63 }
 0x159   : > { %v608_v61 = vpop.f32.mrf.mxu0  ;;  %v659_v10 = vadd.f32 %v658_v53, %v548_v63 }
 0x15a   : > { %v649_v62 = vpop.f32.mrf.mxu1  ;;  %v609_v18 = vadd.f32 %v608_v61, %v533_v15  ;;  %v739_v61 = vpop.permute.xlu1 %738 }
 0x15b   : > { %v650_v22 = vadd.f32 %v649_v62, %v533_v15  ;;  %v734_v62 = vpop.permute.xlu2 %733 }
 0x15f   : > { %v620_v59 = vpop.f32.mrf.mxu2 }
 0x160   : > { %v661_v60 = vpop.f32.mrf.mxu3  ;;  %v621_v3 = vadd.f32 %v620_v59, %v553_v54 }
 0x161   : > { %v662_v7 = vadd.f32 %v661_v60, %v553_v54  ;;  %v611_v2 = vpop.f32.mrf.mxu0 }
 0x162   : > { %v652_v12 = vpop.f32.mrf.mxu1  ;;  %v612_v14 = vadd.f32 %v611_v2, %v538_v6 }
 0x163   : > { %v653_v16 = vadd.f32 %v652_v12, %v538_v6 }
 0x167   : > { %v623_v1 = vpop.f32.mrf.mxu2 }
 0x168   : > { %v624_v4 = vadd.f32 %v623_v1, %v558_v50  ;;  %v664_v5 = vpop.f32.mrf.mxu3  ;;  %v729_v1 = vpop.permute.xlu0 %728 }
 0x169   : > { %v665_v8 = vadd.f32 %v664_v5, %v558_v50 }
 0x16a   : > { %1360 = vtanh.f32 %v624_v4 }
 0x16b   : > { %1362 = vtanh.f32 %v665_v8  ;;  %v719_v8 = vpop.permute.xlu2 %718 }
 0x16c   : > { %1364 = vtanh.f32 %v621_v3  ;;  %v724_v3 = vpop.permute.xlu1 %723 }
 0x16d   : > { %1366 = vtanh.f32 %v662_v7 }
 0x16e   : > { %1368 = vtanh.f32 %v618_v9 }
 0x16f   : > { %1370 = vtanh.f32 %v659_v10 }
 0x170   : > { %v1361_v17 = vpop.eup %1360  ;;  %1372 = vtanh.f32 %v615_v11  ;;  %v714_v15 = vpop.permute.xlu0 %713 }
 0x171   : > { %v1363_v19 = vpop.eup %1362  ;;  %1374 = vtanh.f32 %v656_v13  ;;  %773 = vmatpush.msrb.mxu2 %v1361_v17 }
 0x172   : > { %v1365_v23 = vpop.eup %1364  ;;  %1376 = vtanh.f32 %v612_v14  ;;  %814 = vmatpush.msrb.mxu3 %v1363_v19 }
 0x173   : > { %v1367_v25 = vpop.eup %1366  ;;  %1378 = vtanh.f32 %v653_v16  ;;  %774 = vmatpush.msrb.mxu2 %v1365_v23  ;;  %v704_v26 = vpop.permute.xlu2 %703 }
 0x174   : > { %v1369_v28 = vpop.eup %1368  ;;  %1380 = vtanh.f32 %v609_v18  ;;  %815 = vmatpush.msrb.mxu3 %v1367_v25  ;;  %v709_v20 = vpop.permute.xlu1 %708 }
 0x175   : > { %v1371_v21 = vpop.eup %1370  ;;  %1382 = vtanh.f32 %v650_v22  ;;  %775 = vmatpush.msrb.mxu2 %v1369_v28 }
 0x176   : > { %v1373_v31 = vpop.eup %1372  ;;  %1384 = vtanh.f32 %v606_v24  ;;  %816 = vmatpush.msrb.mxu3 %v1371_v21 }
 0x177   : > { %v1375_v55 = vpop.eup %1374  ;;  %1386 = vtanh.f32 %v647_v27  ;;  %776 = vmatpush.msrb.mxu2 %v1373_v31 }
 0x178   : > { %v1377_v56 = vpop.eup %1376  ;;  %1388 = vtanh.f32 %v603_v29  ;;  %817 = vmatpush.msrb.mxu3 %v1375_v55 }
 0x179   : > { %v1379_v57 = vpop.eup %1378  ;;  %1390 = vtanh.f32 %v644_v30  ;;  %777 = vmatpush.msrb.mxu2 %v1377_v56 }
 0x17a   : > { %v1381_v58 = vpop.eup %1380  ;;  %818 = vmatpush.msrb.mxu3 %v1379_v57 }
 0x17b   : > { %v1383_v32 = vpop.eup %1382  ;;  %778 = vmatpush.msrb.mxu2 %v1381_v58 }
 0x17c   : > { %v1385_v33 = vpop.eup %1384  ;;  %819 = vmatpush.msrb.mxu3 %v1383_v32 }
 0x17d   : > { %v1387_v34 = vpop.eup %1386  ;;  %779 = vmatpush.msrb.mxu2 %v1385_v33 }
 0x17e   : > { %v1389_v36 = vpop.eup %1388  ;;  %820 = vmatpush.msrb.mxu3 %v1387_v34 }
 0x17f   : > { %v1391_v37 = vpop.eup %1390  ;;  %780 = vmatpush.msrb.mxu2 %v1389_v36 }
 0x180   : > { %821 = vmatpush.msrb.mxu3 %v1391_v37  ;;  %1243 = vmatmul.msk.f32.vlgmr.msrb.gmra.mxu2 %vm560_vm0, %v1227_v35 }
 0x181   : > { %1251 = vmatmul.msk.f32.vlgmr.msrb.gmra.mxu3 %vm560_vm0, %v1227_v35  ;;  %v1259_v35 = vld [vmem:[%s1859_s3 + $0x80] sm:$0xff] }
 0x188   : > { %1244 = vmatmul.msk.f32.gmra.mxu2 %vm560_vm0, %v1228_v38 }
 0x189   : > { %1252 = vmatmul.msk.f32.gmra.mxu3 %vm560_vm0, %v1228_v38  ;;  %v1260_v38 = vld [vmem:[%s1859_s3 + $0x88] sm:$0xff] }
 0x190   : > { %1245 = vmatmul.msk.f32.gmra.mxu2 %vm560_vm0, %v1229_v39 }
 0x191   : > { %1253 = vmatmul.msk.f32.gmra.mxu3 %vm560_vm0, %v1229_v39  ;;  %v1261_v39 = vld [vmem:[%s1859_s3 + $0x90] sm:$0xff] }
 0x198   : > { %1246 = vmatmul.msk.f32.gmra.mxu2 %vm560_vm0, %v1230_v40 }
 0x199   : > { %1254 = vmatmul.msk.f32.gmra.mxu3 %vm560_vm0, %v1230_v40  ;;  %v1262_v40 = vld [vmem:[%s1859_s3 + $0x98] sm:$0xff] }
 0x1a0   : > { %1247 = vmatmul.msk.f32.gmra.mxu2 %vm560_vm0, %v1231_v41 }
 0x1a1   : > { %1255 = vmatmul.msk.f32.gmra.mxu3 %vm560_vm0, %v1231_v41  ;;  %v1263_v41 = vld [vmem:[%s1859_s3 + $0xa0] sm:$0xff] }
 0x1a8   : > { %1248 = vmatmul.msk.f32.gmra.mxu2 %vm560_vm0, %v1232_v42 }
 0x1a9   : > { %1256 = vmatmul.msk.f32.gmra.mxu3 %vm560_vm0, %v1232_v42  ;;  %v1264_v42 = vld [vmem:[%s1859_s3 + $0xa8] sm:$0xff] }
 0x1b0   : > { %1249 = vmatmul.msk.f32.gmra.mxu2 %vm560_vm0, %v1233_v43 }
 0x1b1   : > { %1257 = vmatmul.msk.f32.gmra.mxu3 %vm560_vm0, %v1233_v43  ;;  %v1265_v43 = vld [vmem:[%s1859_s3 + $0xb0] sm:$0xff] }
 0x1b8   : > { %1250 = vmatmul.msk.f32.gmra.mxu2 %vm560_vm0, %v1234_v44 }
 0x1b9   : > { %1258 = vmatmul.msk.f32.gmra.mxu3 %vm560_vm0, %v1234_v44  ;;  %v1266_v44 = vld [vmem:[%s1859_s3 + $0xb8] sm:$0xff] }
 0x203   : > { %v782_v45 = vpop.f32.mrf.mxu2 }
 0x204   : > { %v823_v46 = vpop.f32.mrf.mxu3  ;;  %v783_v29 = vadd.f32 %v782_v45, %v704_v26 }
 0x205   : > { %v824_v30 = vadd.f32 %v823_v46, %v704_v26 }
 0x20b   : > { %v785_v47 = vpop.f32.mrf.mxu2 }
 0x20c   : > { %v826_v48 = vpop.f32.mrf.mxu3  ;;  %v786_v24 = vadd.f32 %v785_v47, %v709_v20 }
 0x20d   : > { %v827_v27 = vadd.f32 %v826_v48, %v709_v20 }
 0x213   : > { %v788_v49 = vpop.f32.mrf.mxu2 }
 0x214   : > { %v829_v51 = vpop.f32.mrf.mxu3  ;;  %v789_v18 = vadd.f32 %v788_v49, %v714_v15  ;;  %v884_v49 = vpop.permute.xlu0 %883 }
 0x215   : > { %v830_v22 = vadd.f32 %v829_v51, %v714_v15 }
 0x21b   : > { %v791_v52 = vpop.f32.mrf.mxu2 }
 0x21c   : > { %v832_v53 = vpop.f32.mrf.mxu3  ;;  %v792_v14 = vadd.f32 %v791_v52, %v719_v8 }
 0x21d   : > { %v833_v16 = vadd.f32 %v832_v53, %v719_v8  ;;  %v889_v53 = vpop.permute.xlu1 %888 }
 0x223   : > { %v794_v50 = vpop.f32.mrf.mxu2 }
 0x224   : > { %v835_v54 = vpop.f32.mrf.mxu3  ;;  %v795_v12 = vadd.f32 %v794_v50, %v724_v3  ;;  %v894_v50 = vpop.permute.xlu2 %893 }
 0x225   : > { %v836_v13 = vadd.f32 %v835_v54, %v724_v3 }
 0x22b   : > { %v797_v59 = vpop.f32.mrf.mxu2 }
 0x22c   : > { %v838_v60 = vpop.f32.mrf.mxu3  ;;  %v798_v2 = vadd.f32 %v797_v59, %v729_v1  ;;  %v899_v59 = vpop.permute.xlu0 %898 }
 0x22d   : > { %v839_v11 = vadd.f32 %v838_v60, %v729_v1 }
 0x233   : > { %v800_v63 = vpop.f32.mrf.mxu2 }
 0x234   : > { %v841_v0 = vpop.f32.mrf.mxu3  ;;  %v801_v5 = vadd.f32 %v800_v63, %v734_v62  ;;  %v1054_v1 = vpop.permute.xlu0 %1053 }
 0x235   : > { %v842_v9 = vadd.f32 %v841_v0, %v734_v62  ;;  %v909_v62 = vpop.permute.xlu2 %908 }
 0x23b   : > { %v803_v4 = vpop.f32.mrf.mxu2 }
 0x23c   : > { %v804_v6 = vadd.f32 %v803_v4, %v739_v61  ;;  %v844_v7 = vpop.f32.mrf.mxu3 }
 0x23d   : > { %v845_v10 = vadd.f32 %v844_v7, %v739_v61  ;;  %v904_v61 = vpop.permute.xlu1 %903 }
 0x23e   : > { %1392 = vtanh.f32 %v804_v6 }
 0x23f   : > { %1394 = vtanh.f32 %v845_v10 }
 0x240   : > { %1396 = vtanh.f32 %v801_v5 }
 0x241   : > { %1398 = vtanh.f32 %v842_v9  ;;  %v914_v9 = vpop.permute.xlu2 %913 }
 0x242   : > { %1400 = vtanh.f32 %v798_v2 }
 0x243   : > { %1402 = vtanh.f32 %v839_v11 }
 0x244   : > { %v1393_v17 = vpop.eup %1392  ;;  %1404 = vtanh.f32 %v795_v12 }
 0x245   : > { %v1395_v19 = vpop.eup %1394  ;;  %1406 = vtanh.f32 %v836_v13  ;;  %953 = vmatpush.msrb.mxu0 %v1393_v17  ;;  %v1059_v5 = vpop.permute.xlu1 %1058 }
 0x246   : > { %v1397_v23 = vpop.eup %1396  ;;  %1408 = vtanh.f32 %v792_v14  ;;  %994 = vmatpush.msrb.mxu1 %v1395_v19  ;;  %v1064_v14 = vpop.permute.xlu0 %1063 }
 0x247   : > { %v1399_v25 = vpop.eup %1398  ;;  %1410 = vtanh.f32 %v833_v16  ;;  %954 = vmatpush.msrb.mxu0 %v1397_v23 }
 0x248   : > { %v1401_v28 = vpop.eup %1400  ;;  %1412 = vtanh.f32 %v789_v18  ;;  %995 = vmatpush.msrb.mxu1 %v1399_v25 }
 0x249   : > { %v1403_v21 = vpop.eup %1402  ;;  %1414 = vtanh.f32 %v830_v22  ;;  %955 = vmatpush.msrb.mxu0 %v1401_v28 }
 0x24a   : > { %v1405_v31 = vpop.eup %1404  ;;  %1416 = vtanh.f32 %v786_v24  ;;  %996 = vmatpush.msrb.mxu1 %v1403_v21  ;;  %v1069_v21 = vpop.permute.xlu2 %1068 }
 0x24b   : > { %v1407_v55 = vpop.eup %1406  ;;  %1418 = vtanh.f32 %v827_v27  ;;  %956 = vmatpush.msrb.mxu0 %v1405_v31 }
 0x24c   : > { %v1409_v56 = vpop.eup %1408  ;;  %1420 = vtanh.f32 %v783_v29  ;;  %997 = vmatpush.msrb.mxu1 %v1407_v55 }
 0x24d   : > { %v1411_v57 = vpop.eup %1410  ;;  %1422 = vtanh.f32 %v824_v30  ;;  %957 = vmatpush.msrb.mxu0 %v1409_v56  ;;  %v919_v24 = vpop.permute.xlu1 %918 }
 0x24e   : > { %v1413_v58 = vpop.eup %1412  ;;  %998 = vmatpush.msrb.mxu1 %v1411_v57 }
 0x24f   : > { %v1415_v32 = vpop.eup %1414  ;;  %958 = vmatpush.msrb.mxu0 %v1413_v58 }
 0x250   : > { %v1417_v33 = vpop.eup %1416  ;;  %999 = vmatpush.msrb.mxu1 %v1415_v32 }
 0x251   : > { %v1419_v34 = vpop.eup %1418  ;;  %959 = vmatpush.msrb.mxu0 %v1417_v33 }
 0x252   : > { %v1421_v36 = vpop.eup %1420  ;;  %1000 = vmatpush.msrb.mxu1 %v1419_v34  ;;  %v1074_v34 = vpop.permute.xlu0 %1073 }
 0x253   : > { %v1423_v37 = vpop.eup %1422  ;;  %960 = vmatpush.msrb.mxu0 %v1421_v36 }
 0x254   : > { %1001 = vmatpush.msrb.mxu1 %v1423_v37  ;;  %1275 = vmatmul.msk.f32.vlgmr.msrb.gmra.mxu0 %vm560_vm0, %v1259_v35 }
 0x255   : > { %1283 = vmatmul.msk.f32.vlgmr.msrb.gmra.mxu1 %vm560_vm0, %v1259_v35 }
 0x25c   : > { %1276 = vmatmul.msk.f32.gmra.mxu0 %vm560_vm0, %v1260_v38 }
 0x25d   : > { %1284 = vmatmul.msk.f32.gmra.mxu1 %vm560_vm0, %v1260_v38 }
 0x264   : > { %1277 = vmatmul.msk.f32.gmra.mxu0 %vm560_vm0, %v1261_v39 }
 0x265   : > { %1285 = vmatmul.msk.f32.gmra.mxu1 %vm560_vm0, %v1261_v39 }
 0x26c   : > { %1278 = vmatmul.msk.f32.gmra.mxu0 %vm560_vm0, %v1262_v40 }
 0x26d   : > { %1286 = vmatmul.msk.f32.gmra.mxu1 %vm560_vm0, %v1262_v40 }
 0x274   : > { %1279 = vmatmul.msk.f32.gmra.mxu0 %vm560_vm0, %v1263_v41 }
 0x275   : > { %1287 = vmatmul.msk.f32.gmra.mxu1 %vm560_vm0, %v1263_v41 }
 0x27c   : > { %1280 = vmatmul.msk.f32.gmra.mxu0 %vm560_vm0, %v1264_v42 }
 0x27d   : > { %1288 = vmatmul.msk.f32.gmra.mxu1 %vm560_vm0, %v1264_v42 }
 0x284   : > { %1281 = vmatmul.msk.f32.gmra.mxu0 %vm560_vm0, %v1265_v43 }
 0x285   : > { %1289 = vmatmul.msk.f32.gmra.mxu1 %vm560_vm0, %v1265_v43 }
 0x28c   : > { %1282 = vmatmul.msk.f32.gmra.mxu0 %vm560_vm0, %v1266_v44 }
 0x28d   : > { %1290 = vmatmul.msk.f32.gmra.mxu1 %vm560_vm0, %v1266_v44 }
 0x2d1   : > { %v962_v45 = vpop.f32.mrf.mxu0 }
 0x2d2   : > { %v1003_v46 = vpop.f32.mrf.mxu1  ;;  %v963_v3 = vadd.f32 %v962_v45, %v884_v49 }
 0x2d3   : > { %v1004_v4 = vadd.f32 %v1003_v46, %v884_v49 }
 0x2d4   : > { %1424 = vtanh.f32 %v963_v3 }
 0x2d5   : > { %1426 = vtanh.f32 %v1004_v4 }
 0x2d9   : > { %v965_v47 = vpop.f32.mrf.mxu0 }
 0x2da   : > { %v1006_v48 = vpop.f32.mrf.mxu1  ;;  %v966_v6 = vadd.f32 %v965_v47, %v889_v53  ;;  %v1425_v17 = vpop.eup %1424 }
 0x2db   : > { %v1007_v7 = vadd.f32 %v1006_v48, %v889_v53  ;;  %v1427_v19 = vpop.eup %1426  ;;  %v1091_v58 = vmul.f32 %v1425_v17, %v1054_v1 }
 0x2dc   : > { %1428 = vtanh.f32 %v966_v6  ;;  %v1092_v35 = vmul.f32 %v1427_v19, %v1054_v1 }
 0x2dd   : > { %1430 = vtanh.f32 %v1007_v7  ;;  %v1089_v7 = vpop.permute.xlu0 %1088 }
 0x2e1   : > { %v968_v51 = vpop.f32.mrf.mxu0 }
 0x2e2   : > { %v1009_v52 = vpop.f32.mrf.mxu1  ;;  %v969_v10 = vadd.f32 %v968_v51, %v894_v50  ;;  %v1429_v23 = vpop.eup %1428 }
 0x2e3   : > { %v1010_v11 = vadd.f32 %v1009_v52, %v894_v50  ;;  %v1431_v27 = vpop.eup %1430  ;;  %v1093_v31 = vmul.f32 %v1429_v23, %v1059_v5  ;;  %v1079_v52 = vpop.permute.xlu1 %1078 }
 0x2e4   : > { %1432 = vtanh.f32 %v969_v10  ;;  %v1094_v56 = vmul.f32 %v1431_v27, %v1059_v5 }
 0x2e5   : > { %1434 = vtanh.f32 %v1010_v11  ;;  %v1107_v38 = vadd.f32 %v1093_v31, %v1091_v58 }
 0x2e6   : > { %v1120_v42 = vadd.f32 %v1094_v56, %v1092_v35 }
 0x2e9   : > { %v971_v54 = vpop.f32.mrf.mxu0 }
 0x2ea   : > { %v1012_v60 = vpop.f32.mrf.mxu1  ;;  %v972_v12 = vadd.f32 %v971_v54, %v899_v59  ;;  %v1433_v29 = vpop.eup %1432 }
 0x2eb   : > { %v1013_v13 = vadd.f32 %v1012_v60, %v899_v59  ;;  %v1435_v30 = vpop.eup %1434  ;;  %v1095_v32 = vmul.f32 %v1433_v29, %v1064_v14 }
 0x2ec   : > { %1436 = vtanh.f32 %v972_v12  ;;  %v1096_v36 = vmul.f32 %v1435_v30, %v1064_v14 }
 0x2ed   : > { %1438 = vtanh.f32 %v1013_v13  ;;  %v1108_v47 = vadd.f32 %v1107_v38, %v1095_v32 }
 0x2ee   : > { %v1121_v53 = vadd.f32 %v1120_v42, %v1096_v36 }
 0x2f1   : > { %v974_v63 = vpop.f32.mrf.mxu0 }
 0x2f2   : > { %v1015_v0 = vpop.f32.mrf.mxu1  ;;  %v975_v15 = vadd.f32 %v974_v63, %v904_v61  ;;  %v1437_v55 = vpop.eup %1436 }
 0x2f3   : > { %v1016_v16 = vadd.f32 %v1015_v0, %v904_v61  ;;  %v1439_v57 = vpop.eup %1438  ;;  %v1097_v39 = vmul.f32 %v1437_v55, %v1069_v21  ;;  %v1084_v61 = vpop.permute.xlu2 %1083 }
 0x2f4   : > { %1440 = vtanh.f32 %v975_v15  ;;  %v1098_v43 = vmul.f32 %v1439_v57, %v1069_v21  ;;  %v1148_v21 = vlaneseq }
 0x2f5   : > { %1442 = vtanh.f32 %v1016_v16  ;;  %v1109_v59 = vadd.f32 %v1108_v47, %v1097_v39 }
 0x2f6   : > { %vm1150_vm2 = vcmp.lt.s32.totalorder %v1148_v21, 256 }
 0x2f9   : > { %v977_v8 = vpop.f32.mrf.mxu0 }
 0x2fa   : > { %v1018_v2 = vpop.f32.mrf.mxu1  ;;  %v978_v18 = vadd.f32 %v977_v8, %v909_v62  ;;  %v1441_v33 = vpop.eup %1440 }
 0x2fb   : > { %v1019_v20 = vadd.f32 %v1018_v2, %v909_v62  ;;  %v1443_v37 = vpop.eup %1442  ;;  %v1099_v48 = vmul.f32 %v1441_v33, %v1074_v34  ;;  %v1122_v62 = vadd.f32 %v1121_v53, %v1098_v43 }
 0x2fc   : > { %1444 = vtanh.f32 %v978_v18  ;;  %v1100_v50 = vmul.f32 %v1443_v37, %v1074_v34 }
 0x2fd   : > { %1446 = vtanh.f32 %v1019_v20  ;;  %v1110_v0 = vadd.f32 %v1109_v59, %v1099_v48 }
 0x2fe   : > { %v1123_v3 = vadd.f32 %v1122_v62, %v1100_v50 }
 0x301   : > { %v980_v22 = vpop.f32.mrf.mxu0 }
 0x302   : > { %v981_v25 = vadd.f32 %v980_v22, %v914_v9  ;;  %v1021_v26 = vpop.f32.mrf.mxu1  ;;  %v1445_v41 = vpop.eup %1444 }
 0x303   : > { %v1022_v28 = vadd.f32 %v1021_v26, %v914_v9  ;;  %v1447_v46 = vpop.eup %1446  ;;  %v1101_v60 = vmul.f32 %v1445_v41, %v1079_v52 }
 0x304   : > { %1448 = vtanh.f32 %v981_v25  ;;  %v1102_v63 = vmul.f32 %v1447_v46, %v1079_v52 }
 0x305   : > { %1450 = vtanh.f32 %v1022_v28  ;;  %v1111_v5 = vadd.f32 %v1110_v0, %v1101_v60 }
 0x306   : > { %v1124_v8 = vadd.f32 %v1123_v3, %v1102_v63 }
 0x309   : > { %v983_v40 = vpop.f32.mrf.mxu0 }
 0x30a   : > { %v984_v44 = vadd.f32 %v983_v40, %v919_v24  ;;  %v1024_v45 = vpop.f32.mrf.mxu1  ;;  %v1449_v51 = vpop.eup %1448 }
 0x30b   : > { %v1025_v49 = vadd.f32 %v1024_v45, %v919_v24  ;;  %v1451_v54 = vpop.eup %1450  ;;  %v1103_v1 = vmul.f32 %v1449_v51, %v1084_v61  ;;  %v1137_v24 = vpop.permute.xlu1 %1136 }
 0x30c   : > { %1452 = vtanh.f32 %v984_v44  ;;  %v1104_v4 = vmul.f32 %v1451_v54, %v1084_v61  ;;  %v1139_v27 = vperm.slane %v1137_v24, 0 }
 0x30d   : > { %1454 = vtanh.f32 %v1025_v49  ;;  %v1112_v10 = vadd.f32 %v1111_v5, %v1103_v1 }
 0x30e   : > { %v1125_v11 = vadd.f32 %v1124_v8, %v1104_v4 }
 0x312   : > { %v1453_v6 = vpop.eup %1452 }
 0x313   : > { %v1455_v9 = vpop.eup %1454  ;;  %v1105_v2 = vmul.f32 %v1453_v6, %v1089_v7 }
 0x314   : > { %v1106_v12 = vmul.f32 %v1455_v9, %v1089_v7 }
 0x315   : > { %v1113_v13 = vadd.f32 %v1112_v10, %v1105_v2 }
 0x316   : > { %v1126_v14 = vadd.f32 %v1125_v11, %v1106_v12 }
 0x317   : > { %v1114_v15 = vrot.slane %v1113_v13, 4 }
 0x318   : > { %v1127_v16 = vrot.slane %v1126_v14, 4 }
 0x319   : > { %v1115_v17 = vadd.f32 %v1114_v15, %v1113_v13 }
 0x31a   : > { %v1128_v18 = vadd.f32 %v1127_v16, %v1126_v14 }
 0x31b   : > { %v1116_v19 = vrot.slane %v1115_v17, 2 }
 0x31c   : > { %v1129_v20 = vrot.slane %v1128_v18, 2 }
 0x31d   : > { %v1117_v22 = vadd.f32 %v1116_v19, %v1115_v17 }
 0x31e   : > { %v1130_v23 = vadd.f32 %v1129_v20, %v1128_v18 }
 0x31f   : > { %v1118_v25 = vrot.slane %v1117_v22, 1 }
 0x320   : > { %v1131_v26 = vrot.slane %v1130_v23, 1 }
 0x321   : > { %v1119_v28 = vadd.f32 %v1118_v25, %v1117_v22 }
 0x322   : > { %v1132_v29 = vadd.f32 %v1131_v26, %v1130_v23 }
 0x323   : > { %v1140_v31 = vadd.f32 %v1139_v27, %v1119_v28 }
 0x324   : > { %v1141_v30 = vadd.f32 %v1139_v27, %v1132_v29 }
 0x326   : > { %v1144_v55 = vrot.slane %v1141_v30, 7 }
 0x328   : > { %v1146_v56 = vsel %vm1145_vm1, %v1140_v31, %v1144_v55 }
 0x329   : > { %1152 = vst.msk [vmem:[%s280_s23] sm:$0x3] %vm1150_vm2, %v1146_v56 }
 0x32a PF: > { %s19_s26 = sadd.s32 1, %s1462_s26  }
 0x32b   : > { %p16_p4 = scmp.ge.s32.totalorder %s19_s26, 6  }
 0x32d   :  { %18 = sbr.rel (!%p16_p4) target bundleno = 3 (0x3), region = 82 }

</bundles_post_ra>
